<compile_context>
chip_gen: v7x
topology: tpu7x:2x2x1
jax: 0.10.0
libtpu: 0.0.40
codegen_flags: <defaults>
</compile_context>

<pallas_src>
import functools

import jax
import jax.numpy as jnp
from jax.experimental import pallas as pl
from jax.experimental.pallas import tpu as pltpu


_TARGET_F32_TILE_BYTES = 8 * 1024 * 1024   # f32-widened working set per logits tile
_VMEM_LIMIT_BYTES = 48 * 1024 * 1024       # < v7x 64 MiB physical, > v5e/v6e scoped defaults


def _round_up(x, m):
    return (x + m - 1) // m * m


def _pick_tile_rows(batch, num_classes):
    # Size the tile by its f32-widened footprint (intermediates are f32 even for bf16
    # logits). No fixed row cap: for small C the tile still reaches ~8 MiB so the
    # ~0.35 us per-grid-step overhead is amortized at the HBM roofline.
    tb = _TARGET_F32_TILE_BYTES // max(1, num_classes * 4)
    tb = max(8, (tb // 8) * 8)               # multiple of 8 sublanes
    tb = min(tb, _round_up(batch, 8))        # never larger than the (row-rounded) batch
    if batch >= 16:
        # Keep at least two tiles so the "parallel" grid axis gives both v7x TCs work.
        tb = min(tb, _round_up(pl.cdiv(batch, 2), 8))
    return tb


def _sigmoid_loss_kernel(logits_ref, weights_ref, partial_ref, *, valid_rows):
    tb, _ = logits_ref.shape
    x = logits_ref[...].astype(jnp.float32)         # (TB, C): widen in-register
    w = weights_ref[...].astype(jnp.float32)        # (1, C)

    # Label-free part of the numerically stable BCE-with-logits:
    #   max(x, 0) + log1p(exp(-|x|)); the "- x * onehot" term is applied in the wrapper.
    base = jnp.maximum(x, 0.0) + jnp.log1p(jnp.exp(-jnp.abs(x)))   # (TB, C)

    # Per-class weighting (VPU) + per-row lane reduce (XLU).
    col = jnp.sum(base * w, axis=-1, keepdims=True)                # (TB, 1)

    # Ragged tail: the last tile's out-of-bounds rows are undefined; use a select
    # (not a multiply) so NaN/Inf from garbage rows cannot leak into the sum.
    row_ids = pl.program_id(0) * tb + jax.lax.broadcasted_iota(jnp.int32, (tb, 1), 0)
    col = jnp.where(row_ids < valid_rows, col, 0.0)

    s = jnp.sum(col)
    # Lane-dense per-tile partial; wrapper reads [:, 0, 0] and finishes the reduction.
    partial_ref[...] = jnp.full((1, 8, 128), s, dtype=jnp.float32)


def sigmoid_loss(pred_logits, targets, per_cls_weights):
    """pred_logits: (B, C) float (any dtype); targets: (B,) int labels;
    per_cls_weights: (C,) float. Returns scalar = sum(w * BCE(logits, onehot)) / B."""
    batch, num_classes = pred_logits.shape
    tb = _pick_tile_rows(batch, num_classes)
    num_tiles = pl.cdiv(batch, tb)

    weights = jnp.asarray(per_cls_weights, dtype=jnp.float32).reshape(1, num_classes)

    partials = pl.pallas_call(
        functools.partial(_sigmoid_loss_kernel, valid_rows=batch),
        out_shape=jax.ShapeDtypeStruct((num_tiles, 8, 128), jnp.float32),
        grid=(num_tiles,),
        in_specs=[
            pl.BlockSpec((tb, num_classes), lambda i: (i, 0)),   # logits tile, HBM dtype
            pl.BlockSpec((1, num_classes), lambda i: (0, 0)),    # weights (block reused)
        ],
        out_specs=pl.BlockSpec((1, 8, 128), lambda i: (i, 0, 0)),
        compiler_params=pltpu.CompilerParams(
            dimension_semantics=("parallel",),                   # let v7x split tiles
            vmem_limit_bytes=_VMEM_LIMIT_BYTES),
    )(pred_logits, weights)

    base_sum = jnp.sum(partials[:, 0, 0])

    # Label correction: subtract sum_r w[t_r] * x[r, t_r] via a tiny B-element gather.
    t = targets.astype(jnp.int32)
    w_vec = jnp.asarray(per_cls_weights, dtype=jnp.float32).reshape(-1)
    x_at_t = jnp.take_along_axis(pred_logits, t[:, None], axis=1)[:, 0].astype(jnp.float32)
    corr = jnp.sum(w_vec[t] * x_at_t)

    return (base_sum - corr) / jnp.float32(batch)


def _reference(pred_logits, targets, per_cls_weights):
    B, C = pred_logits.shape
    t = jax.nn.one_hot(targets, C, dtype=jnp.float32)
    x = pred_logits.astype(jnp.float32)
    loss = jnp.maximum(x, 0.0) - x * t + jnp.log1p(jnp.exp(-jnp.abs(x)))
    loss = loss * jnp.asarray(per_cls_weights, jnp.float32)[None, :]
    return jnp.sum(loss) / B


if __name__ == "__main__":
    key = jax.random.PRNGKey(0)
    k1, k2, k3, k4, k5, k6 = jax.random.split(key, 6)

    # Case 1: aligned small shape, f32 logits (single tile).
    B, C = 8, 16
    logits_f32 = jax.random.normal(k1, (B, C), dtype=jnp.float32)
    labels = jax.random.randint(k2, (B,), 0, C, dtype=jnp.int32)
    w = 0.5 + jnp.arange(C, dtype=jnp.float32) / C
    out = sigmoid_loss(logits_f32, labels, w)
    jax.block_until_ready(out)
    ref = _reference(logits_f32, labels, w)
    assert jnp.allclose(out, ref, rtol=1e-5, atol=1e-5), (out, ref)

    # Case 2: ragged batch (no wrapper pad; OOB tail rows masked in-kernel) and a class
    # count that is not a multiple of 128 (full-extent lane block).
    B2, C2 = 6, 21
    logits2 = jax.random.normal(k3, (B2, C2), dtype=jnp.float32)
    labels2 = jax.random.randint(k4, (B2,), 0, C2, dtype=jnp.int32)
    w2 = 0.25 + jnp.arange(C2, dtype=jnp.float32) / C2
    out2 = sigmoid_loss(logits2, labels2, w2)
    jax.block_until_ready(out2)
    ref2 = _reference(logits2, labels2, w2)
    assert jnp.allclose(out2, ref2, rtol=1e-5, atol=1e-5), (out2, ref2)

    # Case 3: narrow (bf16) logits stay narrow through HBM, widened in-kernel.
    logits_bf16 = logits_f32.astype(jnp.bfloat16)
    out3 = sigmoid_loss(logits_bf16, labels, w)
    jax.block_until_ready(out3)
    ref3 = _reference(logits_bf16, labels, w)   # same bf16->f32 widening as kernel
    assert jnp.allclose(out3, ref3, rtol=1e-5, atol=1e-5), (out3, ref3)

    # Case 4: multi-tile grid (B >= 16 forces >= 2 tiles) with a ragged last tile.
    B4, C4 = 20, 16
    logits4 = jax.random.normal(k5, (B4, C4), dtype=jnp.float32)
    labels4 = jax.random.randint(k6, (B4,), 0, C4, dtype=jnp.int32)
    out4 = sigmoid_loss(logits4, labels4, w)
    jax.block_until_ready(out4)
    ref4 = _reference(logits4, labels4, w)
    assert jnp.allclose(out4, ref4, rtol=1e-5, atol=1e-5), (out4, ref4)

    print("KERNEL_OK")
</pallas_src>

<mosaic_0001>
module attributes {stable_mosaic.version = 11 : i64} {
  func.func @_sigmoid_loss_kernel(%arg0: i32, %arg1: memref<8x16xf32, #tpu.memory_space<vmem>>, %arg2: memref<1x16xf32, #tpu.memory_space<vmem>>, %arg3: memref<1x8x128xf32, #tpu.memory_space<vmem>>) attributes {dimension_semantics = [#tpu.dimension_semantics<parallel>], iteration_bounds = array<i64: 1>, scalar_prefetch = 0 : i64, scratch_operands = 0 : i64, tpu.core_type = #tpu.core_type<tc>, window_params = [{transform_indices = @transform_0, window_bounds = array<i64: 8, 16>}, {pipeline_mode = #tpu.pipeline_mode<synchronous>, transform_indices = @transform_1, window_bounds = array<i64: 1, 16>}, {transform_indices = @transform_2, window_bounds = array<i64: 1, 8, 128>}]} {
    %c0 = arith.constant 0 : index
    %c0_0 = arith.constant 0 : index
    %0 = vector.load %arg1[%c0, %c0_0] : memref<8x16xf32, #tpu.memory_space<vmem>>, vector<8x16xf32>
    %c0_1 = arith.constant 0 : index
    %c0_2 = arith.constant 0 : index
    %1 = vector.load %arg2[%c0_1, %c0_2] : memref<1x16xf32, #tpu.memory_space<vmem>>, vector<1x16xf32>
    %cst = arith.constant 0.000000e+00 : f32
    %2 = vector.broadcast %cst : f32 to vector<8x16xf32>
    %3 = arith.maximumf %0, %2 : vector<8x16xf32>
    %4 = math.absf %0 : vector<8x16xf32>
    %cst_3 = arith.constant 0.000000e+00 : f32
    %5 = vector.broadcast %cst_3 : f32 to vector<8x16xf32>
    %6 = arith.subf %5, %4 : vector<8x16xf32>
    %7 = math.exp %6 : vector<8x16xf32>
    %8 = math.log1p %7 : vector<8x16xf32>
    %9 = arith.addf %3, %8 : vector<8x16xf32>
    %10 = vector.broadcast %1 : vector<1x16xf32> to vector<8x16xf32>
    %11 = arith.mulf %9, %10 : vector<8x16xf32>
    %cst_4 = arith.constant dense<0.000000e+00> : vector<8xf32>
    %12 = vector.multi_reduction <add>, %11, %cst_4 [1] : vector<8x16xf32> to vector<8xf32>
    %13 = vector.shape_cast %12 : vector<8xf32> to vector<8x1xf32>
    %c8_i32 = arith.constant 8 : i32
    %14 = arith.muli %arg0, %c8_i32 : i32
    %15 = tpu.iota {dimensions = array<i32: 0>} : vector<8x1xi32>
    %16 = vector.broadcast %14 : i32 to vector<8x1xi32>
    %17 = arith.addi %16, %15 : vector<8x1xi32>
    %c8_i32_5 = arith.constant 8 : i32
    %18 = vector.broadcast %c8_i32_5 : i32 to vector<8x1xi32>
    %19 = arith.cmpi slt, %17, %18 : vector<8x1xi32>
    %cst_6 = arith.constant 0.000000e+00 : f32
    %20 = vector.broadcast %cst_6 : f32 to vector<8x1xf32>
    %21 = arith.select %19, %13, %20 : vector<8x1xi1>, vector<8x1xf32>
    %22 = vector.shape_cast %21 : vector<8x1xf32> to vector<1x8x1xf32>
    %cst_7 = arith.constant dense<0.000000e+00> : vector<1xf32>
    %23 = vector.multi_reduction <add>, %22, %cst_7 [1, 2] : vector<1x8x1xf32> to vector<1xf32>
    %24 = vector.shape_cast %23 : vector<1xf32> to vector<1x1x1xf32>
    %25 = vector.extract %24[0, 0, 0] : f32 from vector<1x1x1xf32>
    %26 = vector.broadcast %25 : f32 to vector<1x8x128xf32>
    %c0_8 = arith.constant 0 : index
    %c0_9 = arith.constant 0 : index
    %c0_10 = arith.constant 0 : index
    %27 = vector.load %arg3[%c0_8, %c0_9, %c0_10] : memref<1x8x128xf32, #tpu.memory_space<vmem>>, vector<1x8x128xf32>
    tpu.vector_store %arg3[%c0_8, %c0_9, %c0_10], %26 {strides = array<i32>} : memref<1x8x128xf32, #tpu.memory_space<vmem>>, vector<1x8x128xf32>,
    return
  }
  func.func @transform_0(%arg0: i32) -> (i32, i32) {
    %c0_i32 = arith.constant 0 : i32
    %c0_i32_0 = arith.constant 0 : i32
    return %arg0, %c0_i32 : i32, i32
  }
  func.func @transform_1(%arg0: i32) -> (i32, i32) {
    %c0_i32 = arith.constant 0 : i32
    %c0_i32_0 = arith.constant 0 : i32
    %c0_i32_1 = arith.constant 0 : i32
    return %c0_i32, %c0_i32_0 : i32, i32
  }
  func.func @transform_2(%arg0: i32) -> (i32, i32, i32) {
    %c0_i32 = arith.constant 0 : i32
    %c0_i32_0 = arith.constant 0 : i32
    %c0_i32_1 = arith.constant 0 : i32
    return %arg0, %c0_i32, %c0_i32_0 : i32, i32, i32
  }
}

</mosaic_0001>

<bundles_post_ra>
// kernel: tpu_custom_call.1
= control target key start
LH: loop header
LB: loop body
LE: loop exit
PB: predicated region body
PF: predicated region fallthrough
CT: control target
= control target key end

     0   :  { %7 = vsyncpa [#allocation3], 0  ;;  %s188_s0 = inlined_call_operand.hbm [shape: f32[8,16], index: 0, kind: input, shape index: {}]   ;;  %s189_s1 = inlined_call_operand.vmem [shape: f32[1,16], index: 1, kind: input, shape index: {}]   ;;  %s190_s2 = inlined_call_operand.hbm [shape: f32[1,8,128], index: 2, kind: output, shape index: {}]  }
   0x1   :  { %8 = vsyncpa [#allocation4], 0  ;;  %s144_s9 = smov [#allocation2]   ;;  %s96_s13 = scalar_lea.hbm %s188_s0, 128 }
   0x2   :  { %s15_s10 = sshll.u32 %s144_s9, 4  ;;  %p97_p0 = scmp.ne.s32.totalorder %s188_s0, %s96_s13  ;;  %s16_s10 = int_to_ptr.vmem [resolvable:$true] %s15_s10 }
   0x3   :  { %p100_p1 = scmp.lt.u32.totalorder %s96_s13, %s188_s0 }
   0x5   :  { %p102_p2 = pnand %p100_p1, %p97_p0 }
   0x7   :  { %105 = shalt.err (!%p102_p2)
}
   0x8   :  { %s106_s18 = scalar_lea.vmem %s16_s10, 128  ;;  %p111_p4 = scmp.lt.s32.totalorder %s16_s10, %s16_s10 }
   0x9   :  { %p107_p3 = scmp.ne.s32.totalorder %s16_s10, %s106_s18  ;;  %p112_p5 = scmp.lt.s32.totalorder %s106_s18, %s106_s18 }
   0xb   :  { %p113_p6 = por %p112_p5, %p111_p4 }
   0xd   :  { %p114_p7 = pnand %p113_p6, %p107_p3 }
   0xf   :  { %117 = shalt.err (!%p114_p7)
}
  0x10   :  { %18 = dma.hbm_to_vmem [thread:$0]  %s188_s0, 128, %s16_s10, [#allocation3]  }
  0x11   :  { %140 = dma.done.wait [#allocation3], 128  }
  0x12   :  { %141 = vsyncadd [#allocation3], 4294967168  ;;  %v24_v0 = vld [vmem:[#allocation2] sm:$0xff]  ;;  %vm48_vm1 = vcmask 130048   ;;  %vm59_vm2 = vcmask 7168   ;;  %s145_s22 = smov [#allocation5]  }
  0x13   :  { %v27_v1 = vand.u32 2147483647, %v24_v0  ;;  %v26_v11 = vmax.f32 %v24_v0, 0.0  ;;  %v87_v13 = vld [vmem:[%s189_s1] ss:$0 sm:$0xff]  ;;  %s78_s1 = sshll.u32 %s145_s22, 4  ;;  %s79_s1 = int_to_ptr.vmem [resolvable:$true] %s78_s1 }
  0x14   :  { %s118_s24 = scalar_lea.vmem %s79_s1, 128  ;;  %p123_p9 = scmp.lt.s32.totalorder %s79_s1, %s79_s1 }
  0x15   :  { %v28_v2 = vsub.f32 0.0, %v27_v1  ;;  %p119_p8 = scmp.ne.s32.totalorder %s79_s1, %s118_s24  ;;  %p124_p10 = scmp.lt.s32.totalorder %s118_s24, %s118_s24 }
  0x17   :  { %v29_v3 = vmul.f32 1.442695, %v28_v2  ;;  %p125_p11 = por %p124_p10, %p123_p9 }
  0x19   :  { %92 = vpow2.f32 %v29_v3  ;;  %p126_p12 = pnand %p125_p11, %p119_p8 }
  0x23   :  { %v93_v4 = vpop.eup %92 }
  0x24   :  { %v31_v5 = vadd.f32 1.0, %v93_v4  ;;  %v34_v6 = vmul.f32 -0.5, %v93_v4  ;;  %v37_v8 = vand.u32 2147483647, %v93_v4 }
  0x26   :  { %94 = vlog2.f32 %v31_v5  ;;  %v35_v7 = vadd.f32 1.0, %v34_v6  ;;  %vm38_vm0 = vcmp.lt.f32.partialorder %v37_v8, 0.0004427343 }
  0x28   :  { %v36_v9 = vmul.f32 %v93_v4, %v35_v7 }
  0x30   :  { %v95_v10 = vpop.eup %94 }
  0x31   :  { %v33_v12 = vmul.f32 0.6931472, %v95_v10 }
  0x33   :  { %v39_v14 = vsel %vm38_vm0, %v36_v9, %v33_v12 }
  0x34   :  { %v40_v15 = vadd.f32 %v39_v14, %v26_v11 }
  0x36   :  { %v47_v16 = vmul.f32 %v87_v13, %v40_v15 }
  0x38   :  { %v49_v17 = vsel %vm48_vm1, %v47_v16, 0.0 }
  0x39   :  { %50 = vadd.xlane.f32.xlu0 %v49_v17 }
  0xc6   :  { %v51_v18 = vpop.xlane.xlu0 %50 }
  0xc7   :  { %v60_v19 = vsel %vm59_vm2, %v51_v18, 0.0 }
  0xc8   :  { %61 = vadd.xlane.f32.xlu0 %v60_v19 }
 0x155   :  { %v62_v20 = vpop.xlane.xlu0 %61 }
 0x156   :  { %v63_v21 = vrot.slane %v62_v20, 4 }
 0x158   :  { %v64_v22 = vadd.f32 %v63_v21, %v62_v20 }
 0x15a   :  { %v65_v23 = vrot.slane %v64_v22, 2 }
 0x15c   :  { %v66_v24 = vadd.f32 %v65_v23, %v64_v22 }
 0x15e   :  { %v67_v25 = vrot.slane %v66_v24, 1 }
 0x160   :  { %v68_v26 = vadd.f32 %v67_v25, %v66_v24 }
 0x162   :  { %88 = vpush %v68_v26 }
 0x193   :  { %s89_s23 = spop %88 }
 0x194   :  { %v70_v27 = vstv %s89_s23 }
 0x195   :  { %71 = vst [vmem:[#allocation5] sm:$0xff] %v70_v27 }
 0x196   :  { %129 = shalt.err (!%p126_p12)
}
 0x197   :  { %s130_s27 = scalar_lea.hbm %s190_s2, 128 }
 0x198   :  { %p131_p13 = scmp.ne.s32.totalorder %s190_s2, %s130_s27  ;;  %p134_p0 = scmp.lt.u32.totalorder %s130_s27, %s190_s2 }
 0x19a   :  { %p136_p1 = pnand %p134_p0, %p131_p13 }
 0x19c   :  { %139 = shalt.err (!%p136_p1)
}
 0x19d   :  { %81 = dma.vmem_to_hbm [thread:$0]  %s79_s1, 128, %s190_s2, [#allocation4]  }
 0x19e   :  { %142 = dma.done.wait [#allocation4], 128  }
 0x19f   :  { %143 = vsyncadd [#allocation4], 4294967168 }
 0x1a0   :  { %85 = vsyncpa [#allocation3], 1 }
 0x1a1   :  { %86 = vsyncpa [#allocation4], 1 }

</bundles_post_ra>
